<compile_context>
chip_gen: v5e
topology: v5e:2x2
jax: 0.10.0
libtpu: 0.0.40
codegen_flags: <defaults>
</compile_context>

<pallas_src>
import jax
import jax.numpy as jnp
from jax import lax
from jax.experimental import pallas as pl
from jax.experimental.pallas import tpu as pltpu

EPS = 1e-5  # PyTorch BatchNorm1d default


def _round_up(x, m):
    return ((x + m - 1) // m) * m


# ----------------------------------------------------------------------------
# Kernel: one (tb, tn) output tile per grid step ->  o = silu(x @ W' + b')
# ----------------------------------------------------------------------------
def encoder_kernel(x_ref, w_ref, b_ref, o_ref):
    # x: (tb, K) wdtype   w: (K, tn) wdtype   b: (1, tn) f32   o: (tb, tn) out_dtype
    z = jnp.dot(x_ref[...], w_ref[...], preferred_element_type=jnp.float32)
    z = z + b_ref[...]                                   # folded bias (f32)
    o_ref[...] = (z * jax.nn.sigmoid(z)).astype(o_ref.dtype)   # SiLU epilogue


# ----------------------------------------------------------------------------
# One-time parameter preparation (hoisted out of the per-call path):
# fold bn1(eval) + fc1 bias + bn2(eval) into a single weight + bias and cast.
# ----------------------------------------------------------------------------
def prepare_encoder_params(params, *, weight_dtype=jnp.bfloat16):
    f32 = jnp.float32
    s1 = params["bn1_gamma"].astype(f32) * lax.rsqrt(params["bn1_var"].astype(f32) + EPS)
    c1 = params["bn1_beta"].astype(f32) - params["bn1_mean"].astype(f32) * s1
    s2 = params["bn2_gamma"].astype(f32) * lax.rsqrt(params["bn2_var"].astype(f32) + EPS)
    c2 = params["bn2_beta"].astype(f32) - params["bn2_mean"].astype(f32) * s2

    wt = params["fc1_w"].astype(f32).T                       # (d_inp, d_middle)
    w_fold = (wt * s1[:, None] * s2[None, :]).astype(weight_dtype)
    b_fold = ((c1 @ wt + params["fc1_b"].astype(f32)) * s2 + c2).reshape(1, -1)
    return w_fold, b_fold                                    # (K, N) wdtype, (1, N) f32


# ----------------------------------------------------------------------------
# Tile selection: blocks never exceed array dims (last two dims are either a
# multiple of (8,128) or equal the full dim), working set stays VMEM-safe,
# and v7x gets >=2 parallel grid blocks when the problem is big enough.
# ----------------------------------------------------------------------------
def _select_tiles(B, K, N, w_isz, o_isz, tb_max, tn_max):
    tb = min(tb_max, 8 * (B // 8)) if B >= 8 else B
    tn = min(tn_max, 128 * (N // 128)) if N >= 128 else N

    budget = 24 * 1024 * 1024  # double-buffered working-set budget (v7x-safe)

    def vmem_bytes(tb_, tn_):
        return 2 * (tb_ * K * w_isz       # x block
                    + K * tn_ * w_isz     # W' block
                    + tn_ * 4             # b' block
                    + tb_ * tn_ * o_isz)  # output block

    while vmem_bytes(tb, tn) > budget and tn > 128:
        tn = _round_up(tn // 2, 128)
    while vmem_bytes(tb, tn) > budget and tb > 8:
        tb = _round_up(tb // 2, 8)
    # TODO(synk): for very large d_inp a K grid axis ("arbitrary") with an f32
    # accumulator scratch would beat shrinking tb/tn; not needed at these sizes.

    # v7x megacore: ensure >=2 grid blocks when worthwhile (free on v5e/v6e).
    if pl.cdiv(B, tb) * pl.cdiv(N, tn) == 1:
        if tn >= 256:
            tn = _round_up(tn // 2, 128)
        elif tb >= 16:
            tb = _round_up(tb // 2, 8)
    return tb, tn


# ----------------------------------------------------------------------------
# Forward: x (B, d_inp) with pre-folded (w, b) from prepare_encoder_params.
# ----------------------------------------------------------------------------
def encoder_forward(x, w, b, *, out_dtype=jnp.float32, tb_max=256, tn_max=1024):
    B, K = x.shape
    Kw, N = w.shape
    assert Kw == K and b.shape == (1, N)

    w_isz = jnp.dtype(w.dtype).itemsize
    o_isz = jnp.dtype(out_dtype).itemsize
    tb, tn = _select_tiles(B, K, N, w_isz, o_isz, tb_max, tn_max)
    gi, gj = pl.cdiv(B, tb), pl.cdiv(N, tn)

    x = x.astype(w.dtype)  # pre-cast LHS once (bf16 path halves x DMA bytes)

    x_bytes = B * K * w_isz
    w_bytes = K * N * w_isz
    # Put the larger operand in the "fetched once" position; re-stream the small one.
    batch_outer = (x_bytes + gi * w_bytes) <= (w_bytes + gj * x_bytes)
    if batch_outer:
        grid = (gi, gj)
        x_map = lambda i, j: (i, 0)
        n_map = lambda i, j: (0, j)
        o_map = lambda i, j: (i, j)
        streamed = x_bytes + gi * w_bytes
    else:
        grid = (gj, gi)
        x_map = lambda j, i: (i, 0)
        n_map = lambda j, i: (0, j)
        o_map = lambda j, i: (i, j)
        streamed = w_bytes + gj * x_bytes

    return pl.pallas_call(
        encoder_kernel,
        out_shape=jax.ShapeDtypeStruct((B, N), out_dtype),
        grid=grid,
        in_specs=[
            pl.BlockSpec((tb, K), x_map),   # x  (batch-tiled, K whole)
            pl.BlockSpec((K, tn), n_map),   # W' (N-tiled)
            pl.BlockSpec((1, tn), n_map),   # b' (N-tiled)
        ],
        out_specs=pl.BlockSpec((tb, tn), o_map),
        compiler_params=pltpu.CompilerParams(
            dimension_semantics=("parallel", "parallel"),
            vmem_limit_bytes=64 * 1024 * 1024,
        ),
        cost_estimate=pl.CostEstimate(
            flops=2 * B * K * N,
            transcendentals=B * N,
            bytes_accessed=streamed + N * 4 + B * N * o_isz,
        ),
    )(x, w, b)


# ----------------------------------------------------------------------------
# Test scaffolding
# ----------------------------------------------------------------------------
def make_params(key, d_inp, d_middle):
    ks = jax.random.split(key, 10)
    return {
        "bn1_gamma": jax.random.normal(ks[0], (d_inp,), jnp.float32) * 0.1 + 1.0,
        "bn1_beta":  jax.random.normal(ks[1], (d_inp,), jnp.float32) * 0.1,
        "bn1_mean":  jax.random.normal(ks[2], (d_inp,), jnp.float32) * 0.1,
        "bn1_var":   jnp.abs(jax.random.normal(ks[3], (d_inp,), jnp.float32)) * 0.1 + 1.0,
        "fc1_w": jax.random.normal(ks[4], (d_middle, d_inp), jnp.float32)
                 * (1.0 / jnp.sqrt(d_inp)),
        "fc1_b": jax.random.normal(ks[5], (d_middle,), jnp.float32) * 0.01,
        "bn2_gamma": jax.random.normal(ks[6], (d_middle,), jnp.float32) * 0.1 + 1.0,
        "bn2_beta":  jax.random.normal(ks[7], (d_middle,), jnp.float32) * 0.1,
        "bn2_mean":  jax.random.normal(ks[8], (d_middle,), jnp.float32) * 0.1,
        "bn2_var":   jnp.abs(jax.random.normal(ks[9], (d_middle,), jnp.float32)) * 0.1 + 1.0,
    }


def encoder_ref(x, p):
    """Pure-JAX reference for the same eval-mode forward (unfused math)."""
    h = (x - p["bn1_mean"]) / jnp.sqrt(p["bn1_var"] + EPS) * p["bn1_gamma"] + p["bn1_beta"]
    z = h @ p["fc1_w"].T + p["fc1_b"]
    z = (z - p["bn2_mean"]) / jnp.sqrt(p["bn2_var"] + EPS) * p["bn2_gamma"] + p["bn2_beta"]
    return z * jax.nn.sigmoid(z)


if __name__ == "__main__":
    key = jax.random.PRNGKey(0)
    fwd = jax.jit(encoder_forward,
                  static_argnames=("out_dtype", "tb_max", "tn_max"))

    # Case 1: module-spec-sized shapes (batch=8, d_inp=32, d_middle=64).
    kx, kp, key = jax.random.split(key, 3)
    x1 = jax.random.normal(kx, (8, 32), jnp.float32)
    p1 = make_params(kp, 32, 64)
    ref1 = encoder_ref(x1, p1)

    # Strict-parity path: f32 folded weight, f32 output.
    w1, b1 = prepare_encoder_params(p1, weight_dtype=jnp.float32)
    out1 = jax.block_until_ready(fwd(x1, w1, b1, out_dtype=jnp.float32))
    assert out1.shape == ref1.shape
    assert jnp.allclose(out1, ref1, atol=1e-4, rtol=1e-4)

    # Fast path: bf16 weight / LHS / output (relaxed tolerance).
    w1b, b1b = prepare_encoder_params(p1, weight_dtype=jnp.bfloat16)
    out1b = jax.block_until_ready(fwd(x1, w1b, b1b, out_dtype=jnp.bfloat16))
    assert jnp.allclose(out1b.astype(jnp.float32), ref1, atol=2e-2, rtol=2e-2)

    # Case 2: ragged shapes exercising cdiv tiling + masked edge blocks
    # (B not a multiple of 8, d_middle not a multiple of 128 -> 2x2 grid).
    kx2, kp2 = jax.random.split(key)
    x2 = jax.random.normal(kx2, (52, 40), jnp.float32)
    p2 = make_params(kp2, 40, 200)
    ref2 = encoder_ref(x2, p2)
    w2, b2 = prepare_encoder_params(p2, weight_dtype=jnp.float32)
    out2 = jax.block_until_ready(fwd(x2, w2, b2, out_dtype=jnp.float32))
    assert out2.shape == ref2.shape
    assert jnp.allclose(out2, ref2, atol=1e-4, rtol=1e-4)

    print("KERNEL_OK")
</pallas_src>

<mosaic_0001>
module attributes {stable_mosaic.version = 11 : i64} {
  func.func @encoder_kernel(%arg0: i32, %arg1: i32, %arg2: memref<8x32xf32, #tpu.memory_space<vmem>>, %arg3: memref<32x64xf32, #tpu.memory_space<vmem>>, %arg4: memref<1x64xf32, #tpu.memory_space<vmem>>, %arg5: memref<8x64xf32, #tpu.memory_space<vmem>>) attributes {dimension_semantics = [#tpu.dimension_semantics<parallel>, #tpu.dimension_semantics<parallel>], iteration_bounds = array<i64: 1, 1>, scalar_prefetch = 0 : i64, scratch_operands = 0 : i64, tpu.core_type = #tpu.core_type<tc>, window_params = [{transform_indices = @transform_0, window_bounds = array<i64: 8, 32>}, {transform_indices = @transform_1, window_bounds = array<i64: 32, 64>}, {transform_indices = @transform_2, window_bounds = array<i64: 1, 64>}, {transform_indices = @transform_3, window_bounds = array<i64: 8, 64>}]} {
    %c0 = arith.constant 0 : index
    %c0_0 = arith.constant 0 : index
    %0 = vector.load %arg2[%c0, %c0_0] : memref<8x32xf32, #tpu.memory_space<vmem>>, vector<8x32xf32>
    %c0_1 = arith.constant 0 : index
    %c0_2 = arith.constant 0 : index
    %1 = vector.load %arg3[%c0_1, %c0_2] : memref<32x64xf32, #tpu.memory_space<vmem>>, vector<32x64xf32>
    %cst = arith.constant dense<0.000000e+00> : vector<8x64xf32>
    %2 = tpu.matmul %0, %1, %cst {dimension_numbers = #tpu.dot_dimension_numbers<[1], [0], [0], [1], [0, 0, 1, 1], [], []>} : vector<8x32xf32>, vector<32x64xf32>, vector<8x64xf32> -> vector<8x64xf32>
    %c0_3 = arith.constant 0 : index
    %c0_4 = arith.constant 0 : index
    %3 = vector.load %arg4[%c0_3, %c0_4] : memref<1x64xf32, #tpu.memory_space<vmem>>, vector<1x64xf32>
    %4 = vector.broadcast %3 : vector<1x64xf32> to vector<8x64xf32>
    %5 = arith.addf %2, %4 : vector<8x64xf32>
    %6 = arith.negf %5 : vector<8x64xf32>
    %7 = math.exp %6 : vector<8x64xf32>
    %cst_5 = arith.constant 1.000000e+00 : f32
    %8 = vector.broadcast %cst_5 : f32 to vector<8x64xf32>
    %9 = arith.addf %8, %7 : vector<8x64xf32>
    %10 = arith.divf %8, %9 : vector<8x64xf32>
    %11 = arith.mulf %5, %10 : vector<8x64xf32>
    %c0_6 = arith.constant 0 : index
    %c0_7 = arith.constant 0 : index
    %12 = vector.load %arg5[%c0_6, %c0_7] : memref<8x64xf32, #tpu.memory_space<vmem>>, vector<8x64xf32>
    tpu.vector_store %arg5[%c0_6, %c0_7], %11 {strides = array<i32>} : memref<8x64xf32, #tpu.memory_space<vmem>>, vector<8x64xf32>,
    return
  }
  func.func @transform_0(%arg0: i32, %arg1: i32) -> (i32, i32) {
    %c0_i32 = arith.constant 0 : i32
    %c0_i32_0 = arith.constant 0 : i32
    return %arg0, %c0_i32 : i32, i32
  }
  func.func @transform_1(%arg0: i32, %arg1: i32) -> (i32, i32) {
    %c0_i32 = arith.constant 0 : i32
    %c0_i32_0 = arith.constant 0 : i32
    return %c0_i32, %arg1 : i32, i32
  }
  func.func @transform_2(%arg0: i32, %arg1: i32) -> (i32, i32) {
    %c0_i32 = arith.constant 0 : i32
    %c0_i32_0 = arith.constant 0 : i32
    return %c0_i32, %arg1 : i32, i32
  }
  func.func @transform_3(%arg0: i32, %arg1: i32) -> (i32, i32) {
    %c0_i32 = arith.constant 0 : i32
    return %arg0, %arg1 : i32, i32
  }
}

</mosaic_0001>

<bundles_post_ra>
// kernel: encoder_forward.1
= control target key start
LH: loop header
LB: loop body
LE: loop exit
PB: predicated region body
PF: predicated region fallthrough
CT: control target
= control target key end

     0   :  { %8 = vsyncpa [#allocation3], 0  ;;  %s245_s0 = inlined_call_operand.hbm [shape: f32[8,32], index: 0, kind: input, shape index: {}]   ;;  %s246_s1 = inlined_call_operand.hbm [shape: f32[32,64], index: 1, kind: input, shape index: {}]   ;;  %s247_s2 = inlined_call_operand.vmem [shape: f32[1,64], index: 2, kind: input, shape index: {}]   ;;  %s248_s3 = inlined_call_operand.hbm [shape: f32[8,64], index: 3, kind: output, shape index: {}]  }
   0x1   :  { %9 = vsyncpa [#allocation6], 0 }
   0x2   :  { %10 = vsyncpa [#allocation4], 0  ;;  %s16_s14 = sshll.u32 %s245_s0, 4  ;;  %s208_s15 = smov [#allocation2]   ;;  %s17_s14 = int_to_ptr.hbm [resolvable:$true] %s16_s14 }
   0x3   :  { %s18_s16 = sshll.u32 %s208_s15, 4  ;;  %s26_s19 = sshll.u32 %s246_s1, 4  ;;  %s19_s16 = int_to_ptr.vmem [resolvable:$true] %s18_s16  ;;  %s27_s19 = int_to_ptr.hbm [resolvable:$true] %s26_s19 }
   0x4   :  { %21 = dma.hbm_to_vmem [thread:$0]  %s17_s14, 128, %s19_s16, [#allocation3]  }
   0x5   :  { %s209_s20 = smov [#allocation5]   ;;  %s210_s22 = smov 128  }
   0x6   :  { %s28_s21 = sshll.u32 %s209_s20, 4  ;;  %s211_s23 = smov 8   ;;  %s29_s21 = int_to_ptr.vmem [resolvable:$true] %s28_s21 }
   0x7   :  { %34 = dma.hbm_to_vmem [thread:$0]  %s27_s19, 512, %s29_s21, [#allocation6], %s210_s22, %s210_s22, %s211_s23  }
   0x8   :  { %202 = dma.done.wait [#allocation3], 128  }
   0x9   :  { %203 = vsyncadd [#allocation3], 4294967168 }
   0xa   :  { %204 = dma.done.wait [#allocation6], 512  }
   0xb   :  { %205 = vsyncadd [#allocation6], 4294966784  ;;  %v49_v0 = vld [vmem:[#allocation5 + $0x18] sm:$0xff]  ;;  %v48_v1 = vld [vmem:[#allocation5 + $0x10] sm:$0xff]  ;;  %vm54_vm0 = vcmask 261120   ;;  %s212_s24 = smov [#allocation7]  }
   0xc   :  { %70 = vmatpush.msra.mxu0 %v49_v0  ;;  %v47_v2 = vld [vmem:[#allocation5 + $0x8] sm:$0xff]  ;;  %v46_v3 = vld [vmem:[#allocation5] sm:$0xff]  ;;  %v45_v4 = vld [vmem:[#allocation2] sm:$0xff]  ;;  %s107_s27 = sshll.u32 %s248_s3, 4  ;;  %vm98_vm5 = vcmask 523264   ;;  %s108_s27 = int_to_ptr.hbm [resolvable:$true] %s107_s27 }
   0xd   :  { %v125_v5 = vld [vmem:[%s247_s2] ss:$0 sm:$0xff]  ;;  %s105_s2 = sshll.u32 %s212_s24, 4  ;;  %s106_s2 = int_to_ptr.vmem [resolvable:$true] %s105_s2 }
   0xe   :  { %71 = vmatpush.msra.mxu0 %v48_v1 }
  0x10   :  { %72 = vmatpush.msra.mxu0 %v47_v2 }
  0x12   :  { %73 = vmatpush.msra.mxu0 %v46_v3 }
  0x13   :  { %118 = vmatmul.msk.f32.vlgmr.msra.gmra.mxu0 %vm54_vm0, %v45_v4 }
  0x90   :  { %v75_v6 = vpop.f32.mrf.mxu0 }
  0x91   :  { %v76_v7 = vadd.f32 %v125_v5, %v75_v6 }
  0x93   :  { %v119_v8 = vmul.f32 -1.442695, %v76_v7 }
  0x95   :  { %126 = vpow2.f32 %v119_v8 }
  0x9b   :  { %v127_v9 = vpop.eup %126 }
  0x9c   :  { %v81_v10 = vadd.f32 1.0, %v127_v9 }
  0x9e   :  { %128 = vrcp.f32 %v81_v10  ;;  %v93_v14 = vand.u32 2147483648, %v81_v10  ;;  %v91_v16 = vand.u32 2147483647, %v81_v10  ;;  %vm87_vm2 = vweird.f32 %v81_v10 }
  0xa0   :  { %v94_v18 = vor.u32 1.1754944e-38, %v93_v14  ;;  %vm92_vm4 = vcmp.eq.f32.partialorder %v91_v16, 8.507059e+37 }
  0xa4   :  { %v129_v11 = vpop.eup %128 }
  0xa5   :  { %v83_v12 = vmul.f32 %v129_v11, %v81_v10  ;;  %vm88_vm1 = vweird.f32 %v129_v11 }
  0xa6   :  { %vm89_vm3 = vmor %vm87_vm2, %vm88_vm1 }
  0xa7   :  { %v84_v13 = vsub.f32 1.0, %v83_v12 }
  0xa9   :  { %v85_v15 = vmul.f32 %v129_v11, %v84_v13 }
  0xab   :  { %v86_v17 = vadd.f32 %v129_v11, %v85_v15 }
  0xad   :  { %v90_v19 = vsel %vm89_vm3, %v129_v11, %v86_v17 }
  0xae   :  { %v95_v20 = vsel %vm92_vm4, %v94_v18, %v90_v19 }
  0xaf   :  { %v97_v21 = vmul.f32 %v95_v20, %v76_v7 }
  0xb1   :  { %99 = vst.msk [vmem:[#allocation7] sm:$0xff] %vm98_vm5, %v97_v21 }
  0xb2   :  { %110 = dma.vmem_to_hbm [thread:$0]  %s106_s2, 128, %s108_s27, [#allocation4]  }
  0xb3   :  { %206 = dma.done.wait [#allocation4], 128  }
  0xb4   :  { %207 = vsyncadd [#allocation4], 4294967168 }
  0xb5   :  { %115 = vsyncpa [#allocation3], 1 }
  0xb6   :  { %116 = vsyncpa [#allocation6], 1 }
  0xb7   :  { %117 = vsyncpa [#allocation4], 1 }

</bundles_post_ra>
